<compile_context>
chip_gen: v6e
topology: v6e:2x2x1
jax: 0.10.0
libtpu: 0.0.40
codegen_flags: <defaults>
</compile_context>

<pallas_src>
import numpy as np
import jax
import jax.numpy as jnp
from jax.experimental import pallas as pl
from jax.experimental.pallas import tpu as pltpu


def _round_up(x, m):
    return ((x + m - 1) // m) * m


# ---------------------------------------------------------------------------
# Kernel A: one pass over the (N, M, D) embeddings.
#   - per-speaker centroids (bf16 MXU operand) and w / max(||c||, eps)
#   - per-utterance own-speaker ("diagonal") logit, fully in f32 via the
#     closed-form exclusive-centroid identities
#   - per-utterance 1 / max(||e||, eps)
#   - flattened (NM, D) bf16 copy of the embeddings for kernel B
# ---------------------------------------------------------------------------
def _prep_kernel(w_ref, b_ref, e_ref, ctr_ref, wic_ref, dlg_ref, ive_ref, ebf_ref):
    n_spkr, n_uttr, d_embd = e_ref.shape
    wv = w_ref[0]
    bv = b_ref[0]
    m = float(n_uttr)
    inv_m1 = 1.0 / (m - 1.0)
    inv_eps = 1e6          # 1 / eps, eps = 1e-6 as in F.cosine_similarity

    e3 = e_ref[...]                                           # (N, M, D) f32
    ctr = jnp.sum(e3, axis=1, keepdims=True) * (1.0 / m)      # (N, 1, D) sublane reduce
    csq = jnp.sum(ctr * ctr, axis=2, keepdims=True)           # (N, 1, 1) ||ctr||^2
    dc = jnp.sum(e3 * ctr, axis=2, keepdims=True)             # (N, M, 1) e . ctr_own (f32)
    esq = jnp.sum(e3 * e3, axis=2, keepdims=True)             # (N, M, 1) ||e||^2     (f32)

    # 1 / max(norm, eps) == min(rsqrt(sq), 1/eps); rsqrt(0) = inf -> clamped.
    inv_c = jnp.minimum(jax.lax.rsqrt(csq), inv_eps)          # (N, 1, 1)
    inv_e = jnp.minimum(jax.lax.rsqrt(esq), inv_eps)          # (N, M, 1)

    # Exclusive ("leave own utterance out") centroid terms, closed form, f32:
    #   e . excl   = (M (e . ctr) - ||e||^2) / (M - 1)
    #   ||excl||^2 = (M^2 ||ctr||^2 - 2 M (e . ctr) + ||e||^2) / (M - 1)^2
    dot_x = (m * dc - esq) * inv_m1
    x_sq = jnp.maximum((m * m * csq - 2.0 * m * dc + esq) * (inv_m1 * inv_m1), 0.0)
    inv_x = jnp.minimum(jax.lax.rsqrt(x_sq), inv_eps)

    ctr_ref[...] = ctr.astype(jnp.bfloat16)                   # bf16 MXU lhs for kernel B
    wic_ref[...] = wv * inv_c                                 # w / max(||c||, eps)
    dlg_ref[...] = wv * dot_x * inv_e * inv_x + bv            # own-speaker logit (f32)
    ive_ref[...] = inv_e                                      # 1 / max(||e||, eps)
    # Flatten + cast once in VMEM (no HBM round trip). For M not a multiple of
    # 8 Mosaic inserts an in-VMEM relayout here.
    ebf_ref[...] = e3.reshape(n_spkr * n_uttr, d_embd).astype(jnp.bfloat16)


# ---------------------------------------------------------------------------
# Kernel B: per-tile GE2E loss in a lane-dense (speaker, utterance) layout.
# One bf16 MXU matmul per tile; everything else is cheap VPU work on (N, T).
# ---------------------------------------------------------------------------
def _loss_kernel(b_ref, ctr_ref, wic_ref, dlg_ref, ive_ref, own_ref, e_ref, out_ref):
    n_spkr = ctr_ref.shape[0]
    bv = b_ref[0]

    # (N, D) bf16 contracted with (T, D) bf16 on D -> (N, T) f32,
    # speakers on sublanes, utterances on lanes (no transpose materialized).
    dots = jax.lax.dot_general(ctr_ref[...], e_ref[...],
                               (((1,), (1,)), ((), ())),
                               preferred_element_type=jnp.float32)

    # Membership mask from the precomputed owner row; pad columns carry -1 so
    # garbage from partial edge blocks never reaches the loss.
    spk = jax.lax.broadcasted_iota(jnp.int32, (n_spkr, 1), 0)
    member = spk == own_ref[...]                               # (N, T) bool

    # Off-diagonal logits with w/||c_k|| folded per speaker and 1/||e|| per
    # column; own-speaker column replaced by the precomputed diagonal logit.
    logits = jnp.where(member, dlg_ref[...],
                       dots * wic_ref[...] * ive_ref[...] + bv)  # (N, T)

    # -log_softmax over the speaker (sublane) axis, keep own-speaker entries.
    mx = jnp.max(logits, axis=0, keepdims=True)
    lse = jnp.log(jnp.sum(jnp.exp(logits - mx), axis=0, keepdims=True)) + mx
    partial = jnp.sum(jnp.where(member, lse - logits, 0.0))

    out_ref[...] = jnp.broadcast_to(partial, out_ref.shape)


# ---------------------------------------------------------------------------
# Wrapper
# ---------------------------------------------------------------------------
def ge2e_loss(embeddings, w, b, *, tile_cols=1024):
    """GE2E loss ('softmax' method) of an (N, M, D) batch of embeddings."""
    n_spkr, n_uttr, d_embd = embeddings.shape
    if n_uttr < 2:
        raise ValueError("GE2E loss requires at least 2 utterances per speaker")
    nm = n_spkr * n_uttr

    emb = jnp.asarray(embeddings, jnp.float32)
    w_arr = jnp.asarray(w, jnp.float32).reshape(1)
    b_arr = jnp.asarray(b, jnp.float32).reshape(1)

    # --- kernel A: centroids, per-utterance f32 terms, bf16 embedding copy ---
    ctr3, wic3, dlg3, ive3, ebf = pl.pallas_call(
        _prep_kernel,
        out_shape=(jax.ShapeDtypeStruct((n_spkr, 1, d_embd), jnp.bfloat16),
                   jax.ShapeDtypeStruct((n_spkr, 1, 1), jnp.float32),
                   jax.ShapeDtypeStruct((n_spkr, n_uttr, 1), jnp.float32),
                   jax.ShapeDtypeStruct((n_spkr, n_uttr, 1), jnp.float32),
                   jax.ShapeDtypeStruct((nm, d_embd), jnp.bfloat16)),
        in_specs=[pl.BlockSpec(memory_space=pltpu.MemorySpace.SMEM),      # w
                  pl.BlockSpec(memory_space=pltpu.MemorySpace.SMEM),      # b
                  pl.BlockSpec(memory_space=pltpu.MemorySpace.VMEM)],     # embeddings
        out_specs=(pl.BlockSpec(memory_space=pltpu.MemorySpace.VMEM),) * 5,
    )(w_arr, b_arr, emb)

    # Layout plumbing on the tiny per-speaker / per-utterance arrays only;
    # the (NM, D) bf16 embedding copy goes straight into kernel B untouched.
    ctr = ctr3.reshape(n_spkr, d_embd)
    wic = wic3.reshape(n_spkr, 1)
    dlg = dlg3.reshape(1, nm)
    ive = ive3.reshape(1, nm)

    # --- tile size: big enough to amortize per-step overhead, small enough to
    # keep the live (N, T) f32 temporaries inside the vreg file.
    t = max(128, _round_up(int(tile_cols), 128))
    n_pad8 = _round_up(n_spkr, 8)
    t = min(t, max(128, (32768 // n_pad8) // 128 * 128))
    t = min(t, _round_up(nm, 128))
    num_tiles = (nm + t - 1) // t

    # Owner-speaker id per (padded) utterance column; -1 marks pad columns so
    # garbage from partial edge blocks can never be selected into the loss.
    owner = jnp.repeat(jnp.arange(n_spkr, dtype=jnp.int32), n_uttr)
    owner = jnp.pad(owner, (0, num_tiles * t - nm), constant_values=-1)
    owner = owner.reshape(1, num_tiles * t)

    tile_bytes = t * d_embd * 2                        # bf16 embedding tile
    vmem_limit = int(min(32 * 2**20, max(8 * 2**20, 8 * tile_bytes)))

    partials = pl.pallas_call(
        _loss_kernel,
        out_shape=jax.ShapeDtypeStruct((num_tiles, 8, 128), jnp.float32),
        grid=(num_tiles,),
        in_specs=[
            pl.BlockSpec(memory_space=pltpu.MemorySpace.SMEM),   # b
            # NOTE: the constant-index blocks below are fetched only once;
            # pl.Buffered(1) would also drop their idle second VMEM buffer
            # (a few KB) but is left out to keep the call maximally portable.
            pl.BlockSpec((n_spkr, d_embd), lambda i: (0, 0)),    # centroids (bf16)
            pl.BlockSpec((n_spkr, 1), lambda i: (0, 0)),         # w / max(||c||, eps)
            pl.BlockSpec((1, t), lambda i: (0, i)),              # diag logits
            pl.BlockSpec((1, t), lambda i: (0, i)),              # 1 / max(||e||, eps)
            pl.BlockSpec((1, t), lambda i: (0, i)),              # owner ids
            pl.BlockSpec((t, d_embd), lambda i: (i, 0)),         # bf16 embedding tile
        ],
        out_specs=pl.BlockSpec((1, 8, 128), lambda i: (i, 0, 0)),
        compiler_params=pltpu.CompilerParams(
            dimension_semantics=("parallel",),        # independent per-tile partials
            vmem_limit_bytes=vmem_limit),
    )(b_arr, ctr, wic, dlg, ive, owner, ebf)

    return jnp.sum(partials[:, 0, 0])


# ---------------------------------------------------------------------------
# float64 numpy reference mirroring the PyTorch module exactly.
# (torch.clamp(self.w, 1e-6) in the reference forward is a discarded no-op.)
# ---------------------------------------------------------------------------
def _ref_loss_np(emb, w, b):
    emb = np.asarray(emb, np.float64)
    n, m, _ = emb.shape
    ctr = emb.mean(axis=1)                                        # (N, D)
    excl = (emb.sum(axis=1, keepdims=True) - emb) / (m - 1)       # (N, M, D)
    eps = 1e-6
    logits = np.empty((n, m, n), np.float64)
    for j in range(n):
        for i in range(m):
            x = emb[j, i]
            xn = max(np.sqrt((x * x).sum()), eps)
            for k in range(n):
                c = excl[j, i] if k == j else ctr[k]
                cn = max(np.sqrt((c * c).sum()), eps)
                logits[j, i, k] = (x * c).sum() / (xn * cn) * w + b
    mx = logits.max(axis=2, keepdims=True)
    lse = np.log(np.exp(logits - mx).sum(axis=2, keepdims=True)) + mx
    nls = lse - logits
    return float(sum(nls[j, i, j] for j in range(n) for i in range(m)))


if __name__ == "__main__":
    # Deterministic parameters (module __init__ defaults): w = 10.0, b = -5.0
    init_w, init_b = 10.0, -5.0

    # Small synthetic batch: N=6 speakers, M=24 utterances, D=64 embedding dim.
    # NM = 144 with tile_cols=128 -> two tiles, exercising tiling, a partial
    # edge block, and the parallel per-tile partial-sum reduction.
    key = jax.random.PRNGKey(0)
    n_spkr, n_uttr, d_embd = 6, 24, 64
    embeddings = jax.random.normal(key, (n_spkr, n_uttr, d_embd), dtype=jnp.float32)

    loss = ge2e_loss(embeddings, init_w, init_b, tile_cols=128)
    loss = jax.block_until_ready(loss)

    ref = _ref_loss_np(np.asarray(embeddings), init_w, init_b)
    assert np.isfinite(float(loss)), "kernel produced non-finite loss"
    np.testing.assert_allclose(float(loss), ref, rtol=2e-2, atol=2e-2)
    print("KERNEL_OK")
</pallas_src>

<mosaic_0001>
module attributes {stable_mosaic.version = 11 : i64} {
  func.func @_prep_kernel(%arg0: memref<1xf32, #tpu.memory_space<smem>>, %arg1: memref<1xf32, #tpu.memory_space<smem>>, %arg2: memref<6x24x64xf32, #tpu.memory_space<vmem>>, %arg3: memref<6x1x64xbf16, #tpu.memory_space<vmem>>, %arg4: memref<6x1x1xf32, #tpu.memory_space<vmem>>, %arg5: memref<6x24x1xf32, #tpu.memory_space<vmem>>, %arg6: memref<6x24x1xf32, #tpu.memory_space<vmem>>, %arg7: memref<144x64xbf16, #tpu.memory_space<vmem>>) attributes {dimension_semantics = [], scalar_prefetch = 0 : i64, scratch_operands = 0 : i64, tpu.core_type = #tpu.core_type<tc>} {
    %c0 = arith.constant 0 : index
    %0 = memref.load %arg0[%c0] : memref<1xf32, #tpu.memory_space<smem>>
    %c0_0 = arith.constant 0 : index
    %1 = memref.load %arg1[%c0_0] : memref<1xf32, #tpu.memory_space<smem>>
    %c0_1 = arith.constant 0 : index
    %c0_2 = arith.constant 0 : index
    %c0_3 = arith.constant 0 : index
    %2 = vector.load %arg2[%c0_1, %c0_2, %c0_3] : memref<6x24x64xf32, #tpu.memory_space<vmem>>, vector<6x24x64xf32>
    %cst = arith.constant dense<0.000000e+00> : vector<6x64xf32>
    %3 = vector.multi_reduction <add>, %2, %cst [1] : vector<6x24x64xf32> to vector<6x64xf32>
    %4 = vector.shape_cast %3 : vector<6x64xf32> to vector<6x1x64xf32>
    %cst_4 = arith.constant 0.0416666679 : f32
    %5 = vector.broadcast %cst_4 : f32 to vector<6x1x64xf32>
    %6 = arith.mulf %4, %5 : vector<6x1x64xf32>
    %7 = arith.mulf %6, %6 : vector<6x1x64xf32>
    %cst_5 = arith.constant dense<0.000000e+00> : vector<6x1xf32>
    %8 = vector.multi_reduction <add>, %7, %cst_5 [2] : vector<6x1x64xf32> to vector<6x1xf32>
    %9 = vector.shape_cast %8 : vector<6x1xf32> to vector<6x1x1xf32>
    %10 = vector.broadcast %6 : vector<6x1x64xf32> to vector<6x24x64xf32>
    %11 = arith.mulf %2, %10 : vector<6x24x64xf32>
    %cst_6 = arith.constant dense<0.000000e+00> : vector<6x24xf32>
    %12 = vector.multi_reduction <add>, %11, %cst_6 [2] : vector<6x24x64xf32> to vector<6x24xf32>
    %13 = vector.shape_cast %12 : vector<6x24xf32> to vector<6x24x1xf32>
    %14 = arith.mulf %2, %2 : vector<6x24x64xf32>
    %cst_7 = arith.constant dense<0.000000e+00> : vector<6x24xf32>
    %15 = vector.multi_reduction <add>, %14, %cst_7 [2] : vector<6x24x64xf32> to vector<6x24xf32>
    %16 = vector.shape_cast %15 : vector<6x24xf32> to vector<6x24x1xf32>
    %17 = math.rsqrt %9 : vector<6x1x1xf32>
    %cst_8 = arith.constant 1.000000e+06 : f32
    %18 = vector.broadcast %cst_8 : f32 to vector<6x1x1xf32>
    %19 = arith.minimumf %17, %18 : vector<6x1x1xf32>
    %20 = math.rsqrt %16 : vector<6x24x1xf32>
    %cst_9 = arith.constant 1.000000e+06 : f32
    %21 = vector.broadcast %cst_9 : f32 to vector<6x24x1xf32>
    %22 = arith.minimumf %20, %21 : vector<6x24x1xf32>
    %cst_10 = arith.constant 2.400000e+01 : f32
    %23 = vector.broadcast %cst_10 : f32 to vector<6x24x1xf32>
    %24 = arith.mulf %23, %13 : vector<6x24x1xf32>
    %25 = arith.subf %24, %16 : vector<6x24x1xf32>
    %cst_11 = arith.constant 0.0434782617 : f32
    %26 = vector.broadcast %cst_11 : f32 to vector<6x24x1xf32>
    %27 = arith.mulf %25, %26 : vector<6x24x1xf32>
    %cst_12 = arith.constant 5.760000e+02 : f32
    %28 = vector.broadcast %cst_12 : f32 to vector<6x1x1xf32>
    %29 = arith.mulf %28, %9 : vector<6x1x1xf32>
    %cst_13 = arith.constant 4.800000e+01 : f32
    %30 = vector.broadcast %cst_13 : f32 to vector<6x24x1xf32>
    %31 = arith.mulf %30, %13 : vector<6x24x1xf32>
    %32 = vector.broadcast %29 : vector<6x1x1xf32> to vector<6x24x1xf32>
    %33 = arith.subf %32, %31 : vector<6x24x1xf32>
    %34 = arith.addf %33, %16 : vector<6x24x1xf32>
    %cst_14 = arith.constant 0.00189035921 : f32
    %35 = vector.broadcast %cst_14 : f32 to vector<6x24x1xf32>
    %36 = arith.mulf %34, %35 : vector<6x24x1xf32>
    %cst_15 = arith.constant 0.000000e+00 : f32
    %37 = vector.broadcast %cst_15 : f32 to vector<6x24x1xf32>
    %38 = arith.maximumf %36, %37 : vector<6x24x1xf32>
    %39 = math.rsqrt %38 : vector<6x24x1xf32>
    %cst_16 = arith.constant 1.000000e+06 : f32
    %40 = vector.broadcast %cst_16 : f32 to vector<6x24x1xf32>
    %41 = arith.minimumf %39, %40 : vector<6x24x1xf32>
    %42 = arith.truncf %6 : vector<6x1x64xf32> to vector<6x1x64xbf16>
    %c0_17 = arith.constant 0 : index
    %c0_18 = arith.constant 0 : index
    %c0_19 = arith.constant 0 : index
    %43 = vector.load %arg3[%c0_17, %c0_18, %c0_19] : memref<6x1x64xbf16, #tpu.memory_space<vmem>>, vector<6x1x64xbf16>
    tpu.vector_store %arg3[%c0_17, %c0_18, %c0_19], %42 {strides = array<i32>} : memref<6x1x64xbf16, #tpu.memory_space<vmem>>, vector<6x1x64xbf16>,
    %44 = vector.broadcast %0 : f32 to vector<6x1x1xf32>
    %45 = arith.mulf %44, %19 : vector<6x1x1xf32>
    %c0_20 = arith.constant 0 : index
    %c0_21 = arith.constant 0 : index
    %c0_22 = arith.constant 0 : index
    %46 = vector.load %arg4[%c0_20, %c0_21, %c0_22] : memref<6x1x1xf32, #tpu.memory_space<vmem>>, vector<6x1x1xf32>
    tpu.vector_store %arg4[%c0_20, %c0_21, %c0_22], %45 {strides = array<i32>} : memref<6x1x1xf32, #tpu.memory_space<vmem>>, vector<6x1x1xf32>,
    %47 = vector.broadcast %0 : f32 to vector<6x24x1xf32>
    %48 = arith.mulf %47, %27 : vector<6x24x1xf32>
    %49 = arith.mulf %48, %22 : vector<6x24x1xf32>
    %50 = arith.mulf %49, %41 : vector<6x24x1xf32>
    %51 = vector.broadcast %1 : f32 to vector<6x24x1xf32>
    %52 = arith.addf %50, %51 : vector<6x24x1xf32>
    %c0_23 = arith.constant 0 : index
    %c0_24 = arith.constant 0 : index
    %c0_25 = arith.constant 0 : index
    %53 = vector.load %arg5[%c0_23, %c0_24, %c0_25] : memref<6x24x1xf32, #tpu.memory_space<vmem>>, vector<6x24x1xf32>
    tpu.vector_store %arg5[%c0_23, %c0_24, %c0_25], %52 {strides = array<i32>} : memref<6x24x1xf32, #tpu.memory_space<vmem>>, vector<6x24x1xf32>,
    %c0_26 = arith.constant 0 : index
    %c0_27 = arith.constant 0 : index
    %c0_28 = arith.constant 0 : index
    %54 = vector.load %arg6[%c0_26, %c0_27, %c0_28] : memref<6x24x1xf32, #tpu.memory_space<vmem>>, vector<6x24x1xf32>
    tpu.vector_store %arg6[%c0_26, %c0_27, %c0_28], %22 {strides = array<i32>} : memref<6x24x1xf32, #tpu.memory_space<vmem>>, vector<6x24x1xf32>,
    %55 = vector.shape_cast %2 : vector<6x24x64xf32> to vector<144x64xf32>
    %56 = arith.truncf %55 : vector<144x64xf32> to vector<144x64xbf16>
    %c0_29 = arith.constant 0 : index
    %c0_30 = arith.constant 0 : index
    %57 = vector.load %arg7[%c0_29, %c0_30] : memref<144x64xbf16, #tpu.memory_space<vmem>>, vector<144x64xbf16>
    tpu.vector_store %arg7[%c0_29, %c0_30], %56 {strides = array<i32>} : memref<144x64xbf16, #tpu.memory_space<vmem>>, vector<144x64xbf16>,
    return
  }
}

</mosaic_0001>

<bundles_post_ra>
// kernel: tpu_custom_call.1
= control target key start
LH: loop header
LB: loop body
LE: loop exit
PB: predicated region body
PF: predicated region fallthrough
CT: control target
= control target key end

     0   :  { %15 = vsyncpa [#allocation5], 0  ;;  %s938_s24 = smov [#allocation4]   ;;  %s1807_s0 = inlined_call_operand.<no memory space> [shape: f32[1], index: 0, kind: input, shape index: {}]   ;;  %s1808_s1 = inlined_call_operand.<no memory space> [shape: f32[1], index: 1, kind: input, shape index: {}]   ;;  %s1809_s2 = inlined_call_operand.hbm [shape: f32[6,24,64], index: 2, kind: input, shape index: {}]   ;;  %s1810_s3 = inlined_call_operand.vmem [shape: bf16[6,1,64], index: 3, kind: output, shape index: {0}]   ;;  %s1811_s4 = inlined_call_operand.vmem [shape: f32[6,1,1], index: 4, kind: output, shape index: {1}]   ;;  %s1812_s5 = inlined_call_operand.vmem [shape: f32[6,24,1], index: 5, kind: output, shape index: {2}]   ;;  %s1813_s6 = inlined_call_operand.vmem [shape: f32[6,24,1], index: 6, kind: output, shape index: {3}]   ;;  %s1814_s7 = inlined_call_operand.vmem [shape: bf16[144,64], index: 7, kind: output, shape index: {4}]  }
   0x1   :  { %s25_s25 = sshll.u32 %s938_s24, 4  ;;  %s26_s25 = int_to_ptr.vmem [resolvable:$true] %s25_s25 }
   0x2   :  { %s924_s26 = scalar_lea.vmem %s26_s25, 2304  ;;  %p929_p1 = scmp.lt.s32.totalorder %s26_s25, %s26_s25 }
   0x3   :  { %p925_p0 = scmp.ne.s32.totalorder %s26_s25, %s924_s26  ;;  %p930_p2 = scmp.lt.s32.totalorder %s924_s26, %s924_s26 }
   0x5   :  { %p931_p3 = por %p930_p2, %p929_p1 }
   0x7   :  { %p932_p4 = pnand %p931_p3, %p925_p0 }
   0x9   :  { %935 = shalt.err (!%p932_p4)
}
   0xa   :  { %s939_s27 = smov 128   ;;  %s940_s28 = smov 8  }
   0xb   :  { %31 = dma.hbm_to_vmem [thread:$0]  %s1809_s2, 2304, %s26_s25, [#allocation5], %s939_s27, %s939_s27, %s940_s28  }
   0xc   :  { %936 = dma.done.wait [#allocation5], 2304  }
   0xd   :  { %937 = vsyncadd [#allocation5], 4294964992  ;;  %vm55_vm0 = vcmask 523264   ;;  %v984_v0 = vld [vmem:[#allocation4 + $0x30] sm:$0xff]  ;;  %v986_v1 = vld [vmem:[#allocation4 + $0x38] sm:$0xff]  ;;  %vm753_vm1 = vcmask 519168  }
   0xe   :  { %v988_v2 = vld [vmem:[#allocation4 + $0x40] sm:$0xff]  ;;  %v78_v3 = vsel %vm55_vm0, %v984_v0, 0.0  ;;  %v79_v4 = vsel %vm55_vm0, %v986_v1, 0.0  ;;  %v817_v6 = vpack.c.bf16 %v984_v0, %v984_v0  ;;  %v818_v9 = vpack.c.bf16 %v986_v1, %v986_v1  ;;  %v1004_v11 = vld [vmem:[#allocation4 + $0x8] sm:$0xff]  ;;  %v1006_v12 = vld [vmem:[#allocation4 + $0x10] sm:$0xff] }
   0xf   :  { %v81_v5 = vsel %vm55_vm0, %v988_v2, 0.0  ;;  %v998_v7 = vld [vmem:[#allocation4] sm:$0xff]  ;;  %v80_v8 = vadd.f32 %v79_v4, %v78_v3  ;;  %v819_v10 = vpack.c.bf16 %v988_v2, %v988_v2  ;;  %v57_v14 = vsel %vm55_vm0, %v1004_v11, 0.0  ;;  %v1022_v18 = vld [vmem:[#allocation4 + $0x48] sm:$0xff]  ;;  %v1024_v19 = vld [vmem:[#allocation4 + $0x50] sm:$0xff] }
  0x10   :  { %v56_v13 = vsel %vm55_vm0, %v998_v7, 0.0  ;;  %760 = vst.msk [vmem:[%s1814_s7 + $0x18] sm:$0xf] %vm753_vm1, %v817_v6  ;;  %v59_v15 = vsel %vm55_vm0, %v1006_v12, 0.0  ;;  %v811_v16 = vpack.c.bf16 %v998_v7, %v998_v7  ;;  %v812_v17 = vpack.c.bf16 %v1004_v11, %v1004_v11  ;;  %v1026_v20 = vld [vmem:[#allocation4 + $0x58] sm:$0xff]  ;;  %v1042_v26 = vld [vmem:[#allocation4 + $0x20] sm:$0xff] }
  0x11   :  { %v82_v21 = vadd.f32 %v81_v5, %v80_v8  ;;  %761 = vst.msk [vmem:[%s1814_s7 + $0x1c] sm:$0xf] %vm753_vm1, %v818_v9  ;;  %762 = vst.msk [vmem:[%s1814_s7 + $0x20] sm:$0xf] %vm753_vm1, %v819_v10  ;;  %v58_v22 = vadd.f32 %v57_v14, %v56_v13  ;;  %v813_v23 = vpack.c.bf16 %v1006_v12, %v1006_v12  ;;  %v89_v24 = vsel %vm55_vm0, %v1022_v18, 0.0  ;;  %v1040_v25 = vld [vmem:[#allocation4 + $0x18] sm:$0xff] }
  0x12   :  { %754 = vst.msk [vmem:[%s1814_s7] sm:$0xf] %vm753_vm1, %v811_v16  ;;  %755 = vst.msk [vmem:[%s1814_s7 + $0x4] sm:$0xf] %vm753_vm1, %v812_v17  ;;  %v90_v27 = vsel %vm55_vm0, %v1024_v19, 0.0  ;;  %v92_v28 = vsel %vm55_vm0, %v1026_v20, 0.0  ;;  %v820_v29 = vpack.c.bf16 %v1022_v18, %v1022_v18  ;;  %v821_v30 = vpack.c.bf16 %v1024_v19, %v1024_v19 }
  0x13   :  { %v1060_v31 = vld [vmem:[#allocation4 + $0x28] sm:$0xff]  ;;  %v83_v32 = vrot.slane %v82_v21, 4  ;;  %v60_v33 = vadd.f32 %v59_v15, %v58_v22  ;;  %756 = vst.msk [vmem:[%s1814_s7 + $0x8] sm:$0xf] %vm753_vm1, %v813_v23  ;;  %v91_v34 = vadd.f32 %v90_v27, %v89_v24  ;;  %v822_v35 = vpack.c.bf16 %v1026_v20, %v1026_v20  ;;  %v1068_v36 = vld [vmem:[#allocation4 + $0x78] sm:$0xff]  ;;  %v1070_v37 = vld [vmem:[#allocation4 + $0x80] sm:$0xff] }
  0x14   :  { %763 = vst.msk [vmem:[%s1814_s7 + $0x24] sm:$0xf] %vm753_vm1, %v820_v29  ;;  %764 = vst.msk [vmem:[%s1814_s7 + $0x28] sm:$0xf] %vm753_vm1, %v821_v30  ;;  %v67_v38 = vsel %vm55_vm0, %v1040_v25, 0.0  ;;  %v68_v39 = vsel %vm55_vm0, %v1042_v26, 0.0  ;;  %v814_v41 = vpack.c.bf16 %v1040_v25, %v1040_v25  ;;  %v815_v47 = vpack.c.bf16 %v1042_v26, %v1042_v26 }
  0x15   :  { %v70_v40 = vsel %vm55_vm0, %v1060_v31, 0.0  ;;  %v84_v42 = vadd.f32 %v83_v32, %v82_v21  ;;  %vm536_vm2 = vcmask 516096   ;;  %vm537_vm3 = vsmask.f32 256  ;;  %765 = vst.msk [vmem:[%s1814_s7 + $0x2c] sm:$0xf] %vm753_vm1, %v822_v35 }
  0x16   :  { %v61_v43 = vrot.slane %v60_v33, 4  ;;  %v93_v44 = vadd.f32 %v92_v28, %v91_v34  ;;  %v69_v45 = vadd.f32 %v68_v39, %v67_v38  ;;  %v1092_v46 = vld [vmem:[#allocation4 + $0x88] sm:$0xff]  ;;  %v816_v48 = vpack.c.bf16 %v1060_v31, %v1060_v31  ;;  %757 = vst.msk [vmem:[%s1814_s7 + $0xc] sm:$0xf] %vm753_vm1, %v814_v41  ;;  %v1106_v55 = vld [vmem:[#allocation4 + $0x60] sm:$0xff]  ;;  %v1124_v4 = vld [vmem:[#allocation4 + $0x70] sm:$0xff] }
  0x17   :  { %v111_v49 = vsel %vm55_vm0, %v1068_v36, 0.0  ;;  %v112_v50 = vsel %vm55_vm0, %v1070_v37, 0.0  ;;  %v85_v51 = vrot.slane %v84_v42, 2  ;;  %v1108_v56 = vld [vmem:[#allocation4 + $0x68] sm:$0xff]  ;;  %758 = vst.msk [vmem:[%s1814_s7 + $0x10] sm:$0xf] %vm753_vm1, %v815_v47  ;;  %v826_v59 = vpack.c.bf16 %v1068_v36, %v1068_v36  ;;  %vm1160_vm4 = vmand %vm536_vm2, %vm537_vm3 }
  0x18   :  { %v62_v52 = vadd.f32 %v61_v43, %v60_v33  ;;  %v94_v53 = vrot.slane %v93_v44, 4  ;;  %v71_v54 = vadd.f32 %v70_v40, %v69_v45  ;;  %759 = vst.msk [vmem:[%s1814_s7 + $0x14] sm:$0xf] %vm753_vm1, %v816_v48  ;;  %v113_v57 = vadd.f32 %v112_v50, %v111_v49  ;;  %v545_v41 = vld [vmem:[%s1810_s3 + $0x2] sm:$0x1] }
  0x19   :  { %v114_v58 = vsel %vm55_vm0, %v1092_v46, 0.0  ;;  %v827_v60 = vpack.c.bf16 %v1070_v37, %v1070_v37  ;;  %v86_v61 = vadd.f32 %v85_v51, %v84_v42  ;;  %v828_v6 = vpack.c.bf16 %v1092_v46, %v1092_v46  ;;  %769 = vst.msk [vmem:[%s1814_s7 + $0x3c] sm:$0xf] %vm753_vm1, %v826_v59  ;;  %v539_v49 = vld [vmem:[%s1810_s3] sm:$0x1] }
  0x1a   :  { %v63_v62 = vrot.slane %v62_v52, 2  ;;  %v95_v63 = vadd.f32 %v94_v53, %v93_v44  ;;  %v72_v3 = vrot.slane %v71_v54, 4  ;;  %v115_v5 = vadd.f32 %v114_v58, %v113_v57 }
  0x1b   :  { %770 = vst.msk [vmem:[%s1814_s7 + $0x40] sm:$0xf] %vm753_vm1, %v827_v60  ;;  %v100_v8 = vsel %vm55_vm0, %v1106_v55, 0.0  ;;  %v101_v9 = vsel %vm55_vm0, %v1108_v56, 0.0  ;;  %v87_v10 = vrot.slane %v86_v61, 1  ;;  %v103_v21 = vsel %vm55_vm0, %v1124_v4, 0.0 }
  0x1c   :  { %v64_v13 = vadd.f32 %v63_v62, %v62_v52  ;;  %v96_v14 = vrot.slane %v95_v63, 2  ;;  %v73_v15 = vadd.f32 %v72_v3, %v71_v54  ;;  %v116_v16 = vrot.slane %v115_v5, 4  ;;  %771 = vst.msk [vmem:[%s1814_s7 + $0x44] sm:$0xf] %vm753_vm1, %v828_v6 }
  0x1d   :  { %v102_v17 = vadd.f32 %v101_v9, %v100_v8  ;;  %v823_v22 = vpack.c.bf16 %v1106_v55, %v1106_v55  ;;  %v88_v23 = vadd.f32 %v87_v10, %v86_v61  ;;  %v824_v32 = vpack.c.bf16 %v1108_v56, %v1108_v56 }
  0x1e   :  { %v65_v24 = vrot.slane %v64_v13, 1  ;;  %v97_v27 = vadd.f32 %v96_v14, %v95_v63  ;;  %v74_v28 = vrot.slane %v73_v15, 2  ;;  %v117_v29 = vadd.f32 %v116_v16, %v115_v5  ;;  %v548_v5 = vld [vmem:[%s1810_s3 + $0x3] sm:$0x1] }
  0x1f   :  { %v104_v30 = vadd.f32 %v103_v21, %v102_v17  ;;  %v825_v33 = vpack.c.bf16 %v1124_v4, %v1124_v4  ;;  %766 = vst.msk [vmem:[%s1814_s7 + $0x30] sm:$0xf] %vm753_vm1, %v823_v22  ;;  %v1156_v34 = vmul.f32 0.041666668, %v88_v23  ;;  %767 = vst.msk [vmem:[%s1814_s7 + $0x34] sm:$0xf] %vm753_vm1, %v824_v32 }
  0x20   :  { %v66_v35 = vadd.f32 %v65_v24, %v64_v13  ;;  %v98_v38 = vrot.slane %v97_v27, 1  ;;  %v75_v39 = vadd.f32 %v74_v28, %v73_v15  ;;  %v118_v42 = vrot.slane %v117_v29, 2  ;;  %v542_v13 = vld [vmem:[%s1810_s3 + $0x1] sm:$0x1]  ;;  %v554_v28 = vld [vmem:[%s1810_s3 + $0x5] sm:$0x1] }
  0x21   :  { %v105_v43 = vrot.slane %v104_v30, 4  ;;  %768 = vst.msk [vmem:[%s1814_s7 + $0x38] sm:$0xf] %vm753_vm1, %v825_v33  ;;  %v130_v44 = vmul.f32 %v1156_v34, %v1156_v34  ;;  %v532_v45 = vpack.c.bf16 %v1156_v34, %v1156_v34  ;;  %vm564_vm5 = vcmask 0  }
  0x22   :  { %v122_v47 = vmul.f32 0.041666668, %v66_v35  ;;  %v99_v48 = vadd.f32 %v98_v38, %v97_v27  ;;  %v76_v50 = vrot.slane %v75_v39, 1  ;;  %v119_v51 = vadd.f32 %v118_v42, %v117_v29  ;;  %v551_v42 = vld [vmem:[%s1810_s3 + $0x4] sm:$0x1] }
  0x23   :  { %v106_v52 = vadd.f32 %v105_v43, %v104_v30  ;;  %v140_v53 = vsel %vm55_vm0, %v130_v44, 0.0  ;;  %v546_v54 = vsel %vm1160_vm4, %v532_v45, %v545_v41  ;;  %v225_v41 = vmul.f32 %v1004_v11, %v1004_v11 }
  0x24   :  { %v128_v57 = vmul.f32 %v122_v47, %v122_v47  ;;  %v530_v58 = vpack.c.bf16 %v122_v47, %v122_v47  ;;  %547 = vst [vmem:[%s1810_s3 + $0x2] sm:$0x1] %v546_v54  ;;  %141 = vadd.xlane.f32.xlu1 %v140_v53  ;;  %v1188_v59 = vmul.f32 0.041666668, %v99_v48  ;;  %v77_v60 = vadd.f32 %v76_v50, %v75_v39 }
  0x25   :  { %v120_v61 = vrot.slane %v119_v51, 1  ;;  %v107_v62 = vrot.slane %v106_v52, 2  ;;  %v153_v33 = vmul.f32 %v122_v47, %v1004_v11  ;;  %v152_v43 = vmul.f32 %v122_v47, %v998_v7 }
  0x26   :  { %v134_v63 = vsel %vm55_vm0, %v128_v57, 0.0  ;;  %v540_v3 = vsel %vm1160_vm4, %v530_v58, %v539_v49  ;;  %v131_v6 = vmul.f32 %v1188_v59, %v1188_v59  ;;  %v533_v8 = vpack.c.bf16 %v1188_v59, %v1188_v59 }
  0x27   :  { %541 = vst [vmem:[%s1810_s3] sm:$0x1] %v540_v3  ;;  %135 = vadd.xlane.f32.xlu0 %v134_v63  ;;  %v123_v9 = vmul.f32 0.041666668, %v77_v60  ;;  %v121_v10 = vadd.f32 %v120_v61, %v119_v51  ;;  %v108_v14 = vadd.f32 %v107_v62, %v106_v52  ;;  %v154_v45 = vmul.f32 %v122_v47, %v1006_v12 }
  0x28   :  { %v143_v15 = vsel %vm55_vm0, %v131_v6, 0.0  ;;  %v549_v16 = vsel %vm1160_vm4, %v533_v8, %v548_v5  ;;  %v224_v48 = vmul.f32 %v998_v7, %v998_v7  ;;  %v173_v50 = vsel %vm55_vm0, %v153_v33, 0.0 }
  0x29   :  { %v129_v17 = vmul.f32 %v123_v9, %v123_v9  ;;  %v531_v21 = vpack.c.bf16 %v123_v9, %v123_v9  ;;  %550 = vst [vmem:[%s1810_s3 + $0x3] sm:$0x1] %v549_v16  ;;  %144 = vadd.xlane.f32.xlu1 %v143_v15  ;;  %v1212_v22 = vmul.f32 0.041666668, %v121_v10  ;;  %v109_v23 = vrot.slane %v108_v14, 1 }
  0x2a   :  { %v155_v44 = vmul.f32 %v123_v9, %v1040_v25  ;;  %v157_v51 = vmul.f32 %v123_v9, %v1060_v31  ;;  %v156_v52 = vmul.f32 %v123_v9, %v1042_v26  ;;  %v159_v53 = vmul.f32 %v1156_v34, %v986_v1 }
  0x2b   :  { %v137_v24 = vsel %vm55_vm0, %v129_v17, 0.0  ;;  %v543_v27 = vsel %vm1160_vm4, %v531_v21, %v542_v13  ;;  %v133_v29 = vmul.f32 %v1212_v22, %v1212_v22  ;;  %v535_v30 = vpack.c.bf16 %v1212_v22, %v1212_v22 }
  0x2c   :  { %544 = vst [vmem:[%s1810_s3 + $0x1] sm:$0x1] %v543_v27  ;;  %138 = vadd.xlane.f32.xlu0 %v137_v24  ;;  %v110_v32 = vadd.f32 %v109_v23, %v108_v14  ;;  %v170_v54 = vsel %vm55_vm0, %v152_v43, 0.0  ;;  %v179_v57 = vsel %vm55_vm0, %v155_v44, 0.0  ;;  %v176_v58 = vsel %vm55_vm0, %v154_v45, 0.0 }
  0x2d   :  { %v149_v35 = vsel %vm55_vm0, %v133_v29, 0.0  ;;  %v555_v38 = vsel %vm1160_vm4, %v535_v30, %v554_v28  ;;  %v185_v60 = vsel %vm55_vm0, %v157_v51, 0.0  ;;  %v1266_v61 = vsel %vm55_vm0, %v225_v41, 0.0 }
  0x2e   :  { %v1231_v39 = vmul.f32 0.041666668, %v110_v32  ;;  %556 = vst [vmem:[%s1810_s3 + $0x5] sm:$0x1] %v555_v38  ;;  %150 = vadd.xlane.f32.xlu1 %v149_v35  ;;  %v1269_v40 = vsel %vm55_vm0, %v224_v48, 0.0  ;;  %v227_v62 = vmul.f32 %v1040_v25, %v1040_v25  ;;  %v182_v63 = vsel %vm55_vm0, %v156_v52, 0.0 }
  0x2f   :  { %v191_v3 = vsel %vm55_vm0, %v159_v53, 0.0  ;;  %v158_v5 = vmul.f32 %v1156_v34, %v984_v0  ;;  %v226_v6 = vmul.f32 %v1006_v12, %v1006_v12  ;;  %v229_v9 = vmul.f32 %v1060_v31, %v1060_v31 }
  0x30   :  { %v132_v11 = vmul.f32 %v1231_v39, %v1231_v39  ;;  %v534_v49 = vpack.c.bf16 %v1231_v39, %v1231_v39  ;;  %v1280_v8 = vsel %vm55_vm0, %v227_v62, 0.0  ;;  %v228_v10 = vmul.f32 %v1042_v26, %v1042_v26 }
  0x31   :  { %v231_v25 = vmul.f32 %v986_v1, %v986_v1  ;;  %v1289_v13 = vsel %vm55_vm0, %v226_v6, 0.0  ;;  %v230_v12 = vmul.f32 %v984_v0, %v984_v0  ;;  %v233_v14 = vmul.f32 %v1022_v18, %v1022_v18 }
  0x32   :  { %v146_v47 = vsel %vm55_vm0, %v132_v11, 0.0  ;;  %v552_v7 = vsel %vm1160_vm4, %v534_v49, %v551_v42  ;;  %174 = vadd.xlane.f32.xlu1 %v173_v50  ;;  %v232_v31 = vmul.f32 %v988_v2, %v988_v2  ;;  %v257_v15 = vsel %vm55_vm0, %v229_v9, 0.0 }
  0x33   :  { %553 = vst [vmem:[%s1810_s3 + $0x4] sm:$0x1] %v552_v7  ;;  %147 = vadd.xlane.f32.xlu0 %v146_v47  ;;  %v254_v26 = vsel %vm55_vm0, %v228_v10, 0.0  ;;  %v263_v1 = vsel %vm55_vm0, %v231_v25, 0.0  ;;  %v235_v16 = vmul.f32 %v1026_v20, %v1026_v20  ;;  %v260_v17 = vsel %vm55_vm0, %v230_v12, 0.0 }
  0x34   :  { %v269_v21 = vsel %vm55_vm0, %v233_v14, 0.0  ;;  %v266_v0 = vsel %vm55_vm0, %v232_v31, 0.0  ;;  %v234_v23 = vmul.f32 %v1024_v19, %v1024_v19  ;;  %v237_v27 = vmul.f32 %v1108_v56, %v1108_v56 }
  0x35   :  { %v275_v24 = vsel %vm55_vm0, %v235_v16, 0.0  ;;  %v236_v28 = vmul.f32 %v1106_v55, %v1106_v55  ;;  %v239_v29 = vmul.f32 %v1068_v36, %v1068_v36  ;;  %v238_v32 = vmul.f32 %v1124_v4, %v1124_v4 }
  0x36   :  { %180 = vadd.xlane.f32.xlu1 %v179_v57  ;;  %v272_v30 = vsel %vm55_vm0, %v234_v23, 0.0  ;;  %v241_v33 = vmul.f32 %v1092_v46, %v1092_v46  ;;  %v240_v35 = vmul.f32 %v1070_v37, %v1070_v37  ;;  %v161_v38 = vmul.f32 %v1188_v59, %v1022_v18 }
  0x37   :  { %171 = vadd.xlane.f32.xlu0 %v170_v54  ;;  %v281_v41 = vsel %vm55_vm0, %v237_v27, 0.0  ;;  %v278_v42 = vsel %vm55_vm0, %v236_v28, 0.0  ;;  %v287_v43 = vsel %vm55_vm0, %v239_v29, 0.0  ;;  %v284_v44 = vsel %vm55_vm0, %v238_v32, 0.0 }
  0x38   :  { %v293_v45 = vsel %vm55_vm0, %v241_v33, 0.0  ;;  %v290_v48 = vsel %vm55_vm0, %v240_v35, 0.0  ;;  %v188_v11 = vsel %vm55_vm0, %v158_v5, 0.0  ;;  %v197_v49 = vsel %vm55_vm0, %v161_v38, 0.0 }
  0x39   :  { %v160_v18 = vmul.f32 %v1156_v34, %v988_v2  ;;  %v163_v50 = vmul.f32 %v1188_v59, %v1026_v20  ;;  %v162_v53 = vmul.f32 %v1188_v59, %v1024_v19  ;;  %v165_v47 = vmul.f32 %v1231_v39, %v1108_v56 }
  0x3a   :  { %186 = vadd.xlane.f32.xlu1 %v185_v60  ;;  %v164_v20 = vmul.f32 %v1231_v39, %v1106_v55  ;;  %v167_v34 = vmul.f32 %v1212_v22, %v1068_v36  ;;  %v166_v56 = vmul.f32 %v1231_v39, %v1124_v4  ;;  %v169_v59 = vmul.f32 %v1212_v22, %v1092_v46 }
  0x3b   :  { %177 = vadd.xlane.f32.xlu0 %v176_v58  ;;  %v194_v51 = vsel %vm55_vm0, %v160_v18, 0.0  ;;  %v203_v52 = vsel %vm55_vm0, %v163_v50, 0.0  ;;  %v200_v7 = vsel %vm55_vm0, %v162_v53, 0.0  ;;  %v209_v2 = vsel %vm55_vm0, %v165_v47, 0.0 }
  0x3c   :  { %v206_v54 = vsel %vm55_vm0, %v164_v20, 0.0  ;;  %v215_v19 = vsel %vm55_vm0, %v167_v34, 0.0  ;;  %v212_v57 = vsel %vm55_vm0, %v166_v56, 0.0  ;;  %v221_v55 = vsel %vm55_vm0, %v169_v59, 0.0 }
  0x3d   :  { %v168_v36 = vmul.f32 %v1212_v22, %v1070_v37  ;;  %vm644_vm6 = vcmask 7168  }
  0x3e   :  { %192 = vadd.xlane.f32.xlu1 %v191_v3 }
  0x3f   :  { %183 = vadd.xlane.f32.xlu0 %v182_v63  ;;  %v218_v58 = vsel %vm55_vm0, %v168_v36, 0.0 }
  0x42   :  { %198 = vadd.xlane.f32.xlu1 %v197_v49 }
  0x43   :  { %189 = vadd.xlane.f32.xlu0 %v188_v11 }
  0x46   :  { %204 = vadd.xlane.f32.xlu1 %v203_v52 }
  0x47   :  { %195 = vadd.xlane.f32.xlu0 %v194_v51 }
  0x4a   :  { %210 = vadd.xlane.f32.xlu1 %v209_v2 }
  0x4b   :  { %201 = vadd.xlane.f32.xlu0 %v200_v7 }
  0x4e   :  { %216 = vadd.xlane.f32.xlu1 %v215_v19 }
  0x4f   :  { %207 = vadd.xlane.f32.xlu0 %v206_v54 }
  0x52   :  { %222 = vadd.xlane.f32.xlu1 %v221_v55 }
  0x53   :  { %213 = vadd.xlane.f32.xlu0 %v212_v57 }
  0x56   :  { %246 = vadd.xlane.f32.xlu1 %v1266_v61  ;;  %v1365_v61 = vstv %s1807_s0 }
  0x57   :  { %219 = vadd.xlane.f32.xlu0 %v218_v58 }
  0x5a   :  { %252 = vadd.xlane.f32.xlu1 %v1280_v8 }
  0x5b   :  { %243 = vadd.xlane.f32.xlu0 %v1269_v40 }
  0x5e   :  { %258 = vadd.xlane.f32.xlu1 %v257_v15 }
  0x5f   :  { %249 = vadd.xlane.f32.xlu0 %v1289_v13 }
  0x62   :  { %264 = vadd.xlane.f32.xlu1 %v263_v1 }
  0x63   :  { %255 = vadd.xlane.f32.xlu0 %v254_v26 }
  0x66   :  { %270 = vadd.xlane.f32.xlu1 %v269_v21 }
  0x67   :  { %261 = vadd.xlane.f32.xlu0 %v260_v17 }
  0x6a   :  { %276 = vadd.xlane.f32.xlu1 %v275_v24 }
  0x6b   :  { %267 = vadd.xlane.f32.xlu0 %v266_v0 }
  0x6e   :  { %282 = vadd.xlane.f32.xlu1 %v281_v41 }
  0x6f   :  { %273 = vadd.xlane.f32.xlu0 %v272_v30 }
  0x72   :  { %288 = vadd.xlane.f32.xlu1 %v287_v43 }
  0x73   :  { %279 = vadd.xlane.f32.xlu0 %v278_v42 }
  0x76   :  { %294 = vadd.xlane.f32.xlu1 %v293_v45 }
  0x77   :  { %285 = vadd.xlane.f32.xlu0 %v284_v44 }
  0x7b   :  { %291 = vadd.xlane.f32.xlu0 %v290_v48  ;;  %v1404_v48 = vstv %s1808_s1 }
  0xad   :  { %v142_v37 = vpop.xlane.xlu1 %141 }
  0xae   :  { %832 = vrsqrt.f32 %v142_v37  ;;  %v1406_v11 = vmul.f32 576.0, %v142_v37 }
  0xb0   :  { %v136_v46 = vpop.xlane.xlu0 %135 }
  0xb1   :  { %834 = vrsqrt.f32 %v136_v46  ;;  %v1408_v49 = vmul.f32 576.0, %v136_v46 }
  0xb2   :  { %v145_v4 = vpop.xlane.xlu1 %144 }
  0xb3   :  { %836 = vrsqrt.f32 %v145_v4  ;;  %v1410_v18 = vmul.f32 576.0, %v145_v4 }
  0xb5   :  { %v139_v22 = vpop.xlane.xlu0 %138 }
  0xb6   :  { %838 = vrsqrt.f32 %v139_v22  ;;  %v1412_v50 = vmul.f32 576.0, %v139_v22 }
  0xb7   :  { %v151_v39 = vpop.xlane.xlu1 %150 }
  0xb8   :  { %840 = vrsqrt.f32 %v151_v39  ;;  %v1414_v51 = vmul.f32 576.0, %v151_v39 }
  0xbb   :  { %v833_v60 = vpop.eup %832  ;;  %v175_v62 = vpop.xlane.xlu1 %174 }
  0xbc   :  { %v148_v40 = vpop.xlane.xlu0 %147  ;;  %v304_v63 = vmin.f32 %v833_v60, 1000000.0  ;;  %v405_v43 = vmul.f32 48.0, %v175_v62  ;;  %v1426_v20 = vmul.f32 24.0, %v175_v62 }
  0xbd   :  { %842 = vrsqrt.f32 %v148_v40  ;;  %v1416_v52 = vmul.f32 576.0, %v148_v40 }
  0xbe   :  { %v835_v3 = vpop.eup %834  ;;  %v560_v5 = vmul.f32 %v1365_v61, %v304_v63  ;;  %v423_v34 = vsub.f32 %v1408_v49, %v405_v43 }
  0xbf   :  { %v302_v6 = vmin.f32 %v835_v3, 1000000.0  ;;  %v181_v9 = vpop.xlane.xlu1 %180 }
  0xc0   :  { %v172_v8 = vpop.xlane.xlu0 %171  ;;  %v837_v10 = vpop.eup %836  ;;  %567 = vst.msk [vmem:[%s1811_s4 + $0x2] sm:$0x1] %vm564_vm5, %v560_v5  ;;  %v407_v45 = vmul.f32 48.0, %v181_v9  ;;  %v1434_v59 = vmul.f32 24.0, %v181_v9 }
  0xc1   :  { %v558_v25 = vmul.f32 %v1365_v61, %v302_v6  ;;  %v305_v13 = vmin.f32 %v837_v10, 1000000.0  ;;  %v404_v44 = vmul.f32 48.0, %v172_v8  ;;  %v1429_v54 = vmul.f32 24.0, %v172_v8 }
  0xc2   :  { %v425_v57 = vsub.f32 %v1412_v50, %v407_v45 }
  0xc3   :  { %v839_v12 = vpop.eup %838  ;;  %565 = vst.msk [vmem:[%s1811_s4] sm:$0x1] %vm564_vm5, %v558_v25  ;;  %v561_v14 = vmul.f32 %v1365_v61, %v305_v13  ;;  %v187_v26 = vpop.xlane.xlu1 %186  ;;  %v422_v56 = vsub.f32 %v1408_v49, %v404_v44 }
  0xc4   :  { %v303_v31 = vmin.f32 %v839_v12, 1000000.0  ;;  %v178_v15 = vpop.xlane.xlu0 %177  ;;  %v1420_v47 = vmul.f32 48.0, %v187_v26  ;;  %v1441_v58 = vmul.f32 24.0, %v187_v26 }
  0xc5   :  { %v841_v1 = vpop.eup %840  ;;  %568 = vst.msk [vmem:[%s1811_s4 + $0x3] sm:$0x1] %vm564_vm5, %v561_v14  ;;  %v1418_v53 = vmul.f32 48.0, %v178_v15  ;;  %v1439_v36 = vmul.f32 24.0, %v178_v15 }
  0xc6   :  { %v559_v16 = vmul.f32 %v1365_v61, %v303_v31  ;;  %v307_v17 = vmin.f32 %v841_v1, 1000000.0  ;;  %v427_v22 = vsub.f32 %v1412_v50, %v1420_v47 }
  0xc7   :  { %v193_v0 = vpop.xlane.xlu1 %192  ;;  %v424_v4 = vsub.f32 %v1408_v49, %v1418_v53 }
  0xc8   :  { %566 = vst.msk [vmem:[%s1811_s4 + $0x1] sm:$0x1] %vm564_vm5, %v559_v16  ;;  %v184_v21 = vpop.xlane.xlu0 %183  ;;  %v563_v23 = vmul.f32 %v1365_v61, %v307_v17  ;;  %v1437_v55 = vmul.f32 48.0, %v193_v0  ;;  %v1459_v3 = vmul.f32 24.0, %v193_v0 }
  0xc9   :  { %v1431_v19 = vmul.f32 48.0, %v184_v21  ;;  %v1451_v39 = vmul.f32 24.0, %v184_v21 }
  0xca   :  { %v843_v24 = vpop.eup %842  ;;  %570 = vst.msk [vmem:[%s1811_s4 + $0x5] sm:$0x1] %vm564_vm5, %v563_v23  ;;  %v429_v6 = vsub.f32 %v1406_v11, %v1437_v55 }
  0xcb   :  { %v306_v27 = vmin.f32 %v843_v24, 1000000.0  ;;  %v199_v29 = vpop.xlane.xlu1 %198  ;;  %v426_v63 = vsub.f32 %v1412_v50, %v1431_v19 }
  0xcc   :  { %v190_v28 = vpop.xlane.xlu0 %189  ;;  %v1445_v46 = vmul.f32 48.0, %v199_v29  ;;  %v1467_v9 = vmul.f32 24.0, %v199_v29 }
  0xcd   :  { %v562_v30 = vmul.f32 %v1365_v61, %v306_v27  ;;  %v1443_v37 = vmul.f32 48.0, %v190_v28  ;;  %v1465_v8 = vmul.f32 24.0, %v190_v28 }
  0xce   :  { %v431_v13 = vsub.f32 %v1410_v18, %v1445_v46 }
  0xcf   :  { %569 = vst.msk [vmem:[%s1811_s4 + $0x4] sm:$0x1] %vm564_vm5, %v562_v30  ;;  %v205_v33 = vpop.xlane.xlu1 %204  ;;  %v428_v25 = vsub.f32 %v1406_v11, %v1443_v37 }
  0xd0   :  { %v196_v32 = vpop.xlane.xlu0 %195  ;;  %v1461_v5 = vmul.f32 48.0, %v205_v33  ;;  %v1481_v26 = vmul.f32 24.0, %v205_v33 }
  0xd1   :  { %v1453_v60 = vmul.f32 48.0, %v196_v32  ;;  %v1477_v31 = vmul.f32 24.0, %v196_v32 }
  0xd2   :  { %v433_v21 = vsub.f32 %v1410_v18, %v1461_v5 }
  0xd3   :  { %v211_v38 = vpop.xlane.xlu1 %210  ;;  %v430_v15 = vsub.f32 %v1406_v11, %v1453_v60 }
  0xd4   :  { %v202_v35 = vpop.xlane.xlu0 %201  ;;  %v1475_v14 = vmul.f32 48.0, %v211_v38  ;;  %v1487_v24 = vmul.f32 24.0, %v211_v38 }
  0xd5   :  { %v1473_v12 = vmul.f32 48.0, %v202_v35  ;;  %v1485_v0 = vmul.f32 24.0, %v202_v35 }
  0xd6   :  { %v435_v30 = vsub.f32 %v1416_v52, %v1475_v14 }
  0xd7   :  { %v1399_v42 = vpop.xlane.xlu1 %216  ;;  %v432_v29 = vsub.f32 %v1410_v18, %v1473_v12 }
  0xd8   :  { %v1397_v41 = vpop.xlane.xlu0 %207  ;;  %v1497_v35 = vmul.f32 48.0, %v1399_v42  ;;  %v1504_v50 = vmul.f32 24.0, %v1399_v42 }
  0xd9   :  { %v1494_v32 = vmul.f32 48.0, %v1397_v41  ;;  %v1501_v49 = vmul.f32 24.0, %v1397_v41 }
  0xda   :  { %v437_v41 = vsub.f32 %v1414_v51, %v1497_v35 }
  0xdb   :  { %v1424_v2 = vpop.xlane.xlu1 %222 }
  0xdc   :  { %v1422_v7 = vpop.xlane.xlu0 %213 }
  0xdf   :  { %v247_v62 = vpop.xlane.xlu1 %246 }
  0xe0   :  { %v1455_v40 = vpop.xlane.xlu0 %219  ;;  %844 = vrsqrt.f32 %v247_v62  ;;  %v441_v10 = vadd.f32 %v423_v34, %v247_v62  ;;  %v363_v38 = vsub.f32 %v1426_v20, %v247_v62  ;;  %v434_v20 = vsub.f32 %v1416_v52, %v1494_v32 }
  0xe2   :  { %v459_v1 = vmul.f32 0.0018903592, %v441_v10  ;;  %v381_v62 = vmul.f32 0.04347826, %v363_v38 }
  0xe3   :  { %v253_v17 = vpop.xlane.xlu1 %252 }
  0xe4   :  { %v244_v16 = vpop.xlane.xlu0 %243  ;;  %v477_v27 = vmax.f32 %v459_v1, 0.0  ;;  %v443_v28 = vadd.f32 %v425_v57, %v253_v17 }
  0xe5   :  { %846 = vrsqrt.f32 %v244_v16  ;;  %v440_v23 = vadd.f32 %v422_v56, %v244_v16  ;;  %v362_v47 = vsub.f32 %v1429_v54, %v244_v16  ;;  %v365_v56 = vsub.f32 %v1434_v59, %v253_v17 }
  0xe6   :  { %848 = vrsqrt.f32 %v253_v17  ;;  %v461_v43 = vmul.f32 0.0018903592, %v443_v28  ;;  %v1515_v59 = vmul.f32 48.0, %v1422_v7 }
  0xe7   :  { %v458_v33 = vmul.f32 0.0018903592, %v440_v23  ;;  %850 = vrsqrt.f32 %v477_v27  ;;  %v259_v45 = vpop.xlane.xlu1 %258  ;;  %v380_v27 = vmul.f32 0.04347826, %v362_v47  ;;  %v383_v17 = vmul.f32 0.04347826, %v365_v56 }
  0xe8   :  { %v250_v44 = vpop.xlane.xlu0 %249  ;;  %v479_v34 = vmax.f32 %v461_v43, 0.0  ;;  %v445_v57 = vadd.f32 %v427_v22, %v259_v45  ;;  %v1518_v43 = vmul.f32 48.0, %v1424_v2 }
  0xe9   :  { %v476_v53 = vmax.f32 %v458_v33, 0.0  ;;  %852 = vrsqrt.f32 %v250_v44  ;;  %v442_v19 = vadd.f32 %v424_v4, %v250_v44  ;;  %v364_v54 = vsub.f32 %v1439_v36, %v250_v44 }
  0xea   :  { %854 = vrsqrt.f32 %v259_v45  ;;  %v367_v4 = vsub.f32 %v1441_v58, %v259_v45  ;;  %v463_v16 = vmul.f32 0.0018903592, %v445_v57 }
  0xeb   :  { %856 = vrsqrt.f32 %v476_v53  ;;  %v460_v42 = vmul.f32 0.0018903592, %v442_v19  ;;  %v265_v1 = vpop.xlane.xlu1 %264  ;;  %v382_v45 = vmul.f32 0.04347826, %v364_v54 }
  0xec   :  { %858 = vrsqrt.f32 %v479_v34  ;;  %v256_v10 = vpop.xlane.xlu0 %255  ;;  %v481_v38 = vmax.f32 %v463_v16, 0.0  ;;  %v447_v58 = vadd.f32 %v429_v6, %v265_v1  ;;  %v385_v53 = vmul.f32 0.04347826, %v367_v4 }
  0xed   :  { %860 = vrsqrt.f32 %v256_v10  ;;  %v845_v23 = vpop.eup %844  ;;  %v478_v28 = vmax.f32 %v460_v42, 0.0  ;;  %v444_v33 = vadd.f32 %v426_v63, %v256_v10  ;;  %v572_v63 = vmul.f32 %v1365_v61, %v381_v62 }
  0xee   :  { %862 = vrsqrt.f32 %v265_v1  ;;  %v327_v22 = vmin.f32 %v845_v23, 1000000.0  ;;  %v366_v34 = vsub.f32 %v1451_v39, %v256_v10  ;;  %v465_v56 = vmul.f32 0.0018903592, %v447_v58 }
  0xef   :  { %864 = vrsqrt.f32 %v478_v28  ;;  %v462_v36 = vmul.f32 0.0018903592, %v444_v33  ;;  %v1532_v55 = vpop.xlane.xlu1 %270  ;;  %v571_v62 = vmul.f32 %v1365_v61, %v380_v27  ;;  %v574_v42 = vmul.f32 %v1365_v61, %v383_v17 }
  0xf0   :  { %v1523_v44 = vpop.xlane.xlu0 %261  ;;  %664 = vst.msk [vmem:[%s1813_s6 + $0x8] sm:$0xff] %vm644_vm6, %v327_v22  ;;  %866 = vrsqrt.f32 %v481_v38  ;;  %v369_v39 = vsub.f32 %v1459_v3, %v265_v1  ;;  %v483_v10 = vmax.f32 %v465_v56, 0.0  ;;  %v573_v27 = vmul.f32 %v1365_v61, %v382_v45 }
  0xf1   :  { %v480_v19 = vmax.f32 %v462_v36, 0.0  ;;  %868 = vrsqrt.f32 %v1523_v44  ;;  %v446_v54 = vadd.f32 %v428_v25, %v1523_v44  ;;  %v576_v28 = vmul.f32 %v1365_v61, %v385_v53 }
  0xf2   :  { %v847_v47 = vpop.eup %846  ;;  %v590_v17 = vmul.f32 %v572_v63, %v327_v22  ;;  %v384_v3 = vmul.f32 0.04347826, %v366_v34  ;;  %v449_v58 = vadd.f32 %v431_v13, %v1532_v55  ;;  %v387_v63 = vmul.f32 0.04347826, %v369_v39 }
  0xf3   :  { %v849_v6 = vpop.eup %848  ;;  %v326_v57 = vmin.f32 %v847_v47, 1000000.0  ;;  %870 = vrsqrt.f32 %v480_v19  ;;  %v464_v33 = vmul.f32 0.0018903592, %v446_v54  ;;  %v368_v47 = vsub.f32 %v1465_v8, %v1523_v44  ;;  %v1565_v13 = vpop.xlane.xlu1 %276 }
  0xf4   :  { %v329_v4 = vmin.f32 %v849_v6, 1000000.0  ;;  %v1541_v16 = vpop.xlane.xlu0 %267  ;;  %v851_v23 = vpop.eup %850  ;;  %872 = vrsqrt.f32 %v1532_v55  ;;  %v467_v46 = vmul.f32 0.0018903592, %v449_v58  ;;  %v575_v8 = vmul.f32 %v1365_v61, %v384_v3 }
  0xf5   :  { %663 = vst.msk [vmem:[%s1813_s6] sm:$0xff] %vm644_vm6, %v326_v57  ;;  %v513_v25 = vmin.f32 %v851_v23, 1000000.0  ;;  %874 = vrsqrt.f32 %v483_v10  ;;  %v482_v36 = vmax.f32 %v464_v33, 0.0  ;;  %v589_v56 = vmul.f32 %v571_v62, %v326_v57 }
  0xf6   :  { %v853_v37 = vpop.eup %852  ;;  %666 = vst.msk [vmem:[%s1813_s6 + $0x18] sm:$0xff] %vm644_vm6, %v329_v4  ;;  %876 = vrsqrt.f32 %v1541_v16  ;;  %v592_v39 = vmul.f32 %v574_v42, %v329_v4  ;;  %v485_v23 = vmax.f32 %v467_v46, 0.0  ;;  %v448_v33 = vadd.f32 %v430_v15, %v1541_v16 }
  0xf7   :  { %v855_v1 = vpop.eup %854  ;;  %v328_v38 = vmin.f32 %v853_v37, 1000000.0  ;;  %v608_v53 = vmul.f32 %v590_v17, %v513_v25  ;;  %878 = vrsqrt.f32 %v482_v36  ;;  %v371_v37 = vsub.f32 %v1467_v9, %v1532_v55 }
  0xf8   :  { %v857_v45 = vpop.eup %856  ;;  %v331_v22 = vmin.f32 %v855_v1, 1000000.0  ;;  %880 = vrsqrt.f32 %v1565_v13  ;;  %v1584_v25 = vpop.xlane.xlu0 %273  ;;  %v578_v11 = vmul.f32 %v1365_v61, %v387_v63  ;;  %v466_v60 = vmul.f32 0.0018903592, %v448_v33 }
  0xf9   :  { %v859_v19 = vpop.eup %858  ;;  %v512_v34 = vmin.f32 %v857_v45, 1000000.0  ;;  %665 = vst.msk [vmem:[%s1813_s6 + $0x10] sm:$0xff] %vm644_vm6, %v328_v38  ;;  %v627_v54 = vadd.f32 %v1404_v48, %v608_v53  ;;  %882 = vrsqrt.f32 %v485_v23  ;;  %v591_v55 = vmul.f32 %v573_v27, %v328_v38 }
  0xfa   :  { %v861_v6 = vpop.eup %860  ;;  %v515_v10 = vmin.f32 %v859_v19, 1000000.0  ;;  %668 = vst.msk [vmem:[%s1813_s6 + $0x28] sm:$0xff] %vm644_vm6, %v331_v22  ;;  %v594_v36 = vmul.f32 %v576_v28, %v331_v22  ;;  %v484_v53 = vmax.f32 %v466_v60, 0.0  ;;  %v451_v63 = vadd.f32 %v433_v21, %v1565_v13  ;;  %v1610_v19 = vpop.xlane.xlu1 %282 }
  0xfb   :  { %v863_v44 = vpop.eup %862  ;;  %v607_v57 = vmul.f32 %v589_v56, %v512_v34  ;;  %v330_v62 = vmin.f32 %v861_v6, 1000000.0  ;;  %646 = vst.msk [vmem:[%s1812_s5 + $0x8] sm:$0xff] %vm644_vm6, %v627_v54  ;;  %884 = vrsqrt.f32 %v1584_v25  ;;  %v386_v38 = vmul.f32 0.04347826, %v368_v47 }
  0xfc   :  { %v610_v42 = vmul.f32 %v592_v39, %v515_v10  ;;  %v333_v4 = vmin.f32 %v863_v44, 1000000.0  ;;  %v865_v17 = vpop.eup %864  ;;  %v389_v22 = vmul.f32 0.04347826, %v371_v37  ;;  %886 = vrsqrt.f32 %v484_v53  ;;  %v1623_v39 = vpop.xlane.xlu0 %279 }
  0xfd   :  { %v626_v3 = vadd.f32 %v1404_v48, %v607_v57  ;;  %667 = vst.msk [vmem:[%s1813_s6 + $0x20] sm:$0xff] %vm644_vm6, %v330_v62  ;;  %v867_v15 = vpop.eup %866  ;;  %v514_v9 = vmin.f32 %v865_v17, 1000000.0  ;;  %v469_v46 = vmul.f32 0.0018903592, %v451_v63  ;;  %v450_v5 = vadd.f32 %v432_v29, %v1584_v25 }
  0xfe   :  { %v629_v1 = vadd.f32 %v1404_v48, %v610_v42  ;;  %670 = vst.msk [vmem:[%s1813_s6 + $0x38] sm:$0xff] %vm644_vm6, %v333_v4  ;;  %v869_v58 = vpop.eup %868  ;;  %v517_v45 = vmin.f32 %v867_v15, 1000000.0  ;;  %v593_v10 = vmul.f32 %v575_v8, %v330_v62  ;;  %v370_v47 = vsub.f32 %v1477_v31, %v1541_v16  ;;  %v1647_v60 = vpop.xlane.xlu1 %288 }
  0xff   :  { %645 = vst.msk [vmem:[%s1812_s5] sm:$0xff] %vm644_vm6, %v626_v3  ;;  %v609_v27 = vmul.f32 %v591_v55, %v514_v9  ;;  %v332_v28 = vmin.f32 %v869_v58, 1000000.0  ;;  %v596_v18 = vmul.f32 %v578_v11, %v333_v4  ;;  %v487_v29 = vmax.f32 %v469_v46, 0.0 }
 0x100   :  { %648 = vst.msk [vmem:[%s1812_s5 + $0x18] sm:$0xff] %vm644_vm6, %v629_v1  ;;  %v871_v34 = vpop.eup %870  ;;  %v612_v56 = vmul.f32 %v594_v36, %v517_v45  ;;  %v468_v33 = vmul.f32 0.0018903592, %v450_v5  ;;  %888 = vrsqrt.f32 %v1610_v19  ;;  %v436_v31 = vsub.f32 %v1416_v52, %v1515_v59  ;;  %v1665_v45 = vpop.xlane.xlu0 %285 }
 0x101   :  { %v873_v21 = vpop.eup %872  ;;  %v628_v6 = vadd.f32 %v1404_v48, %v609_v27  ;;  %v516_v54 = vmin.f32 %v871_v34, 1000000.0  ;;  %669 = vst.msk [vmem:[%s1813_s6 + $0x30] sm:$0xff] %vm644_vm6, %v332_v28  ;;  %v577_v16 = vmul.f32 %v1365_v61, %v386_v38  ;;  %890 = vrsqrt.f32 %v487_v29 }
 0x102   :  { %v875_v44 = vpop.eup %874  ;;  %v631_v57 = vadd.f32 %v1404_v48, %v612_v56  ;;  %v335_v12 = vmin.f32 %v873_v21, 1000000.0  ;;  %v580_v3 = vmul.f32 %v1365_v61, %v389_v22  ;;  %v486_v11 = vmax.f32 %v468_v33, 0.0 }
 0x103   :  { %v1626_v23 = vpop.eup %876  ;;  %647 = vst.msk [vmem:[%s1812_s5 + $0x10] sm:$0xff] %vm644_vm6, %v628_v6  ;;  %v611_v8 = vmul.f32 %v593_v10, %v516_v54  ;;  %v519_v62 = vmin.f32 %v875_v44, 1000000.0  ;;  %v595_v1 = vmul.f32 %v577_v16, %v332_v28  ;;  %v453_v9 = vadd.f32 %v435_v30, %v1610_v19  ;;  %v1695_v10 = vpop.xlane.xlu1 %294 }
 0x104   :  { %650 = vst.msk [vmem:[%s1812_s5 + $0x28] sm:$0xff] %vm644_vm6, %v631_v57  ;;  %672 = vst.msk [vmem:[%s1813_s6 + $0x48] sm:$0xff] %vm644_vm6, %v335_v12  ;;  %v334_v42 = vmin.f32 %v1626_v23, 1000000.0  ;;  %v879_v4 = vpop.eup %878  ;;  %892 = vrsqrt.f32 %v1623_v39  ;;  %v388_v36 = vmul.f32 0.04347826, %v370_v47  ;;  %v373_v58 = vsub.f32 %v1481_v26, %v1565_v13 }
 0x105   :  { %v630_v37 = vadd.f32 %v1404_v48, %v611_v8  ;;  %v614_v17 = vmul.f32 %v596_v18, %v519_v62  ;;  %v518_v15 = vmin.f32 %v879_v4, 1000000.0  ;;  %894 = vrsqrt.f32 %v486_v11  ;;  %v881_v53 = vpop.eup %880 }
 0x106   :  { %671 = vst.msk [vmem:[%s1813_s6 + $0x40] sm:$0xff] %vm644_vm6, %v334_v42  ;;  %v471_v14 = vmul.f32 0.0018903592, %v453_v9  ;;  %v452_v30 = vadd.f32 %v434_v20, %v1623_v39  ;;  %896 = vrsqrt.f32 %v1647_v60  ;;  %v883_v27 = vpop.eup %882  ;;  %v420_v28 = vmul.f32 48.0, %v1455_v40 }
 0x107   :  { %649 = vst.msk [vmem:[%s1812_s5 + $0x20] sm:$0xff] %vm644_vm6, %v630_v37  ;;  %v633_v55 = vadd.f32 %v1404_v48, %v614_v17  ;;  %v613_v63 = vmul.f32 %v595_v1, %v518_v15  ;;  %v598_v26 = vmul.f32 %v580_v3, %v335_v12  ;;  %v337_v13 = vmin.f32 %v881_v53, 1000000.0 }
 0x108   :  { %v372_v38 = vsub.f32 %v1485_v0, %v1584_v25  ;;  %v521_v34 = vmin.f32 %v883_v27, 1000000.0  ;;  %v489_v32 = vmax.f32 %v471_v14, 0.0  ;;  %v470_v20 = vmul.f32 0.0018903592, %v452_v30  ;;  %v885_v56 = vpop.eup %884 }
 0x109   :  { %652 = vst.msk [vmem:[%s1812_s5 + $0x38] sm:$0xff] %vm644_vm6, %v633_v55  ;;  %v632_v22 = vadd.f32 %v1404_v48, %v613_v63  ;;  %v579_v46 = vmul.f32 %v1365_v61, %v388_v36  ;;  %v391_v5 = vmul.f32 0.04347826, %v373_v58  ;;  %674 = vst.msk [vmem:[%s1813_s6 + $0x58] sm:$0xff] %vm644_vm6, %v337_v13  ;;  %v455_v21 = vadd.f32 %v437_v41, %v1647_v60  ;;  %v887_v47 = vpop.eup %886  ;;  %v1699_v41 = vpop.xlane.xlu0 %291 }
 0x10a   :  { %v439_v0 = vsub.f32 %v1414_v51, %v1518_v43  ;;  %v616_v25 = vmul.f32 %v598_v26, %v521_v34  ;;  %v336_v6 = vmin.f32 %v885_v56, 1000000.0  ;;  %898 = vrsqrt.f32 %v489_v32 }
 0x10b   :  { %651 = vst.msk [vmem:[%s1812_s5 + $0x30] sm:$0xff] %vm644_vm6, %v632_v22  ;;  %v488_v54 = vmax.f32 %v470_v20, 0.0  ;;  %v390_v44 = vmul.f32 0.04347826, %v372_v38  ;;  %v473_v57 = vmul.f32 0.0018903592, %v455_v21  ;;  %900 = vrsqrt.f32 %v1665_v45 }
 0x10c   :  { %v438_v35 = vsub.f32 %v1414_v51, %v420_v28  ;;  %v635_v43 = vadd.f32 %v1404_v48, %v616_v25  ;;  %v520_v18 = vmin.f32 %v887_v47, 1000000.0  ;;  %v597_v12 = vmul.f32 %v579_v46, %v334_v42  ;;  %673 = vst.msk [vmem:[%s1813_s6 + $0x50] sm:$0xff] %vm644_vm6, %v336_v6 }
 0x10d   :  { %902 = vrsqrt.f32 %v488_v54  ;;  %v375_v29 = vsub.f32 %v1487_v24, %v1610_v19  ;;  %v491_v23 = vmax.f32 %v473_v57, 0.0  ;;  %v454_v51 = vadd.f32 %v436_v31, %v1665_v45  ;;  %v889_v8 = vpop.eup %888 }
 0x10e   :  { %904 = vrsqrt.f32 %v1695_v10  ;;  %654 = vst.msk [vmem:[%s1812_s5 + $0x48] sm:$0xff] %vm644_vm6, %v635_v43  ;;  %v615_v62 = vmul.f32 %v597_v12, %v520_v18  ;;  %v582_v33 = vmul.f32 %v1365_v61, %v391_v5  ;;  %v457_v16 = vadd.f32 %v439_v0, %v1695_v10  ;;  %v891_v24 = vpop.eup %890 }
 0x10f   :  { %906 = vrsqrt.f32 %v1699_v41  ;;  %v339_v19 = vmin.f32 %v889_v8, 1000000.0  ;;  %v374_v52 = vsub.f32 %v1501_v49, %v1623_v39  ;;  %v472_v59 = vmul.f32 0.0018903592, %v454_v51 }
 0x110   :  { %908 = vrsqrt.f32 %v491_v23  ;;  %v634_v31 = vadd.f32 %v1404_v48, %v615_v62  ;;  %v523_v42 = vmin.f32 %v891_v24, 1000000.0  ;;  %v600_v4 = vmul.f32 %v582_v33, %v337_v13 }
 0x111   :  { %v475_v37 = vmul.f32 0.0018903592, %v457_v16  ;;  %v893_v17 = vpop.eup %892  ;;  %v581_v3 = vmul.f32 %v1365_v61, %v390_v44  ;;  %v393_v11 = vmul.f32 0.04347826, %v375_v29  ;;  %676 = vst.msk [vmem:[%s1813_s6 + $0x68] sm:$0xff] %vm644_vm6, %v339_v19  ;;  %v490_v15 = vmax.f32 %v472_v59, 0.0 }
 0x112   :  { %v456_v1 = vadd.f32 %v438_v35, %v1699_v41  ;;  %v895_v49 = vpop.eup %894  ;;  %653 = vst.msk [vmem:[%s1812_s5 + $0x40] sm:$0xff] %vm644_vm6, %v634_v31  ;;  %v618_v39 = vmul.f32 %v600_v4, %v523_v42  ;;  %v338_v9 = vmin.f32 %v893_v17, 1000000.0  ;;  %v377_v55 = vsub.f32 %v1504_v50, %v1647_v60 }
 0x113   :  { %v493_v36 = vmax.f32 %v475_v37, 0.0  ;;  %v897_v58 = vpop.eup %896  ;;  %v522_v53 = vmin.f32 %v895_v49, 1000000.0  ;;  %v599_v63 = vmul.f32 %v581_v3, %v336_v6  ;;  %910 = vrsqrt.f32 %v490_v15 }
 0x114   :  { %v474_v14 = vmul.f32 0.0018903592, %v456_v1  ;;  %v637_v30 = vadd.f32 %v1404_v48, %v618_v39  ;;  %v392_v27 = vmul.f32 0.04347826, %v374_v52  ;;  %675 = vst.msk [vmem:[%s1813_s6 + $0x60] sm:$0xff] %vm644_vm6, %v338_v9  ;;  %v358_v26 = vmul.f32 24.0, %v1422_v7 }
 0x115   :  { %v341_v28 = vmin.f32 %v897_v58, 1000000.0  ;;  %912 = vrsqrt.f32 %v493_v36  ;;  %v617_v13 = vmul.f32 %v599_v63, %v522_v53  ;;  %v361_v60 = vmul.f32 24.0, %v1424_v2 }
 0x116   :  { %v492_v50 = vmax.f32 %v474_v14, 0.0  ;;  %656 = vst.msk [vmem:[%s1812_s5 + $0x58] sm:$0xff] %vm644_vm6, %v637_v30  ;;  %v584_v38 = vmul.f32 %v1365_v61, %v393_v11  ;;  %v395_v7 = vmul.f32 0.04347826, %v377_v55  ;;  %v376_v32 = vsub.f32 %v358_v26, %v1665_v45 }
 0x117   :  { %678 = vst.msk [vmem:[%s1813_s6 + $0x78] sm:$0xff] %vm644_vm6, %v341_v28  ;;  %v899_v22 = vpop.eup %898  ;;  %v636_v34 = vadd.f32 %v1404_v48, %v617_v13  ;;  %v583_v46 = vmul.f32 %v1365_v61, %v392_v27  ;;  %v379_v5 = vsub.f32 %v361_v60, %v1695_v10  ;;  %v360_v0 = vmul.f32 24.0, %v1455_v40 }
 0x118   :  { %914 = vrsqrt.f32 %v492_v50  ;;  %v901_v2 = vpop.eup %900  ;;  %v525_v20 = vmin.f32 %v899_v22, 1000000.0  ;;  %v602_v56 = vmul.f32 %v584_v38, %v339_v19  ;;  %v586_v57 = vmul.f32 %v1365_v61, %v395_v7 }
 0x119   :  { %655 = vst.msk [vmem:[%s1812_s5 + $0x50] sm:$0xff] %vm644_vm6, %v636_v34  ;;  %v340_v25 = vmin.f32 %v901_v2, 1000000.0  ;;  %v601_v47 = vmul.f32 %v583_v46, %v338_v9  ;;  %v394_v35 = vmul.f32 0.04347826, %v376_v32  ;;  %v378_v10 = vsub.f32 %v360_v0, %v1699_v41 }
 0x11a   :  { %v903_v21 = vpop.eup %902  ;;  %v620_v54 = vmul.f32 %v602_v56, %v525_v20  ;;  %v397_v29 = vmul.f32 0.04347826, %v379_v5  ;;  %v604_v8 = vmul.f32 %v586_v57, %v341_v28 }
 0x11b   :  { %v905_v6 = vpop.eup %904  ;;  %v524_v45 = vmin.f32 %v903_v21, 1000000.0  ;;  %677 = vst.msk [vmem:[%s1813_s6 + $0x70] sm:$0xff] %vm644_vm6, %v340_v25  ;;  %v585_v33 = vmul.f32 %v1365_v61, %v394_v35  ;;  %v396_v16 = vmul.f32 0.04347826, %v378_v10 }
 0x11c   :  { %v907_v44 = vpop.eup %906  ;;  %v343_v40 = vmin.f32 %v905_v6, 1000000.0  ;;  %v639_v18 = vadd.f32 %v1404_v48, %v620_v54  ;;  %v588_v19 = vmul.f32 %v1365_v61, %v397_v29 }
 0x11d   :  { %v909_v43 = vpop.eup %908  ;;  %v619_v12 = vmul.f32 %v601_v47, %v524_v45  ;;  %v342_v23 = vmin.f32 %v907_v44, 1000000.0  ;;  %v603_v42 = vmul.f32 %v585_v33, %v340_v25  ;;  %v587_v3 = vmul.f32 %v1365_v61, %v396_v16 }
 0x11e   :  { %v527_v51 = vmin.f32 %v909_v43, 1000000.0  ;;  %680 = vst.msk [vmem:[%s1813_s6 + $0x88] sm:$0xff] %vm644_vm6, %v343_v40  ;;  %658 = vst.msk [vmem:[%s1812_s5 + $0x68] sm:$0xff] %vm644_vm6, %v639_v18  ;;  %v606_v37 = vmul.f32 %v588_v19, %v343_v40 }
 0x11f   :  { %v638_v41 = vadd.f32 %v1404_v48, %v619_v12  ;;  %679 = vst.msk [vmem:[%s1813_s6 + $0x80] sm:$0xff] %vm644_vm6, %v342_v23  ;;  %v605_v39 = vmul.f32 %v587_v3, %v342_v23 }
 0x120   :  { %v622_v62 = vmul.f32 %v604_v8, %v527_v51  ;;  %v911_v24 = vpop.eup %910 }
 0x121   :  { %657 = vst.msk [vmem:[%s1812_s5 + $0x60] sm:$0xff] %vm644_vm6, %v638_v41  ;;  %v526_v31 = vmin.f32 %v911_v24, 1000000.0 }
 0x122   :  { %v913_v52 = vpop.eup %912  ;;  %v641_v59 = vadd.f32 %v1404_v48, %v622_v62 }
 0x123   :  { %v529_v4 = vmin.f32 %v913_v52, 1000000.0  ;;  %v621_v17 = vmul.f32 %v603_v42, %v526_v31 }
 0x124   :  { %660 = vst.msk [vmem:[%s1812_s5 + $0x78] sm:$0xff] %vm644_vm6, %v641_v59 }
 0x125   :  { %v915_v11 = vpop.eup %914  ;;  %v624_v15 = vmul.f32 %v606_v37, %v529_v4  ;;  %v640_v1 = vadd.f32 %v1404_v48, %v621_v17 }
 0x126   :  { %v528_v49 = vmin.f32 %v915_v11, 1000000.0 }
 0x127   :  { %v643_v9 = vadd.f32 %v1404_v48, %v624_v15  ;;  %659 = vst.msk [vmem:[%s1812_s5 + $0x70] sm:$0xff] %vm644_vm6, %v640_v1 }
 0x128   :  { %v623_v55 = vmul.f32 %v605_v39, %v528_v49 }
 0x129   :  { %662 = vst.msk [vmem:[%s1812_s5 + $0x88] sm:$0xff] %vm644_vm6, %v643_v9 }
 0x12a   :  { %v642_v61 = vadd.f32 %v1404_v48, %v623_v55 }
 0x12c   :  { %661 = vst.msk [vmem:[%s1812_s5 + $0x80] sm:$0xff] %vm644_vm6, %v642_v61 }
 0x12d   :  { %792 = vsyncpa [#allocation5], 1 }

</bundles_post_ra>
